<compile_context>
chip_gen: v5e
topology: v5e:2x2
jax: 0.10.0
libtpu: 0.0.40
codegen_flags: <defaults>
</compile_context>

<pallas_src>
import functools
import math

import jax
import jax.numpy as jnp
from jax import lax
from jax.experimental import pallas as pl
from jax.experimental.pallas import tpu as pltpu

_LEAKY_SLOPE = 0.1
_BN_EPS = 1e-5
_ACT_DTYPE = jnp.bfloat16   # inter-layer activation / weight dtype (f32 accumulation)


def _vmem_limit_bytes():
    # ~75% of physical VMEM (v5e/v6e: 128 MiB -> 96 MiB, v7x: 64 MiB -> 48 MiB),
    # leaving headroom for compiler scratch and double buffers.
    try:
        cap = pltpu.get_tpu_info().vmem_capacity_bytes
    except Exception:
        cap = 64 * 1024 * 1024
    return min(int(cap * 3 // 4), 100 * 1024 * 1024)


_VMEM_LIMIT = _vmem_limit_bytes()


def _cp(*dims):
    return pltpu.CompilerParams(dimension_semantics=dims,
                                vmem_limit_bytes=_VMEM_LIMIT)


def _leaky(y):
    return jnp.where(y >= 0, y, _LEAKY_SLOPE * y)


def _divisor_tile(total, target):
    """Largest divisor of `total` that is <= max(target, 1)."""
    t = max(1, min(total, target))
    while total % t:
        t -= 1
    return t


def _aligned_tile(total, target, mult):
    """Largest divisor of `total` <= target that is a multiple of `mult`,
    falling back to the full dimension (always a legal BlockSpec size)."""
    t = min(total, target)
    t -= t % mult
    while t >= mult:
        if total % t == 0:
            return t
        t -= mult
    return total


# ----------------------------- Conv2d kernel (stride 1) ----------------------
def _conv_kernel(x_ref, w_ref, b_ref, o_ref, acc_ref, *, KH, KW, th, OW, leaky):
    # x_ref  : (1, Hp, Wp, Cin) padded input, one sample, VMEM-resident (bf16)
    # w_ref  : (KH, KW, Cin, tc) bf16
    # b_ref  : (1, tc)           f32
    # o_ref  : (1, th, OW, tc)   bf16 output row tile
    # acc_ref: (th*OW, tc)       f32 scratch accumulator
    r = pl.program_id(2)
    row0 = r * th
    tc = acc_ref.shape[1]
    acc_ref[...] = jnp.broadcast_to(b_ref[...], acc_ref.shape)
    for kh in range(KH):
        for kw in range(KW):
            patch = x_ref[0, pl.ds(row0 + kh, th), pl.ds(kw, OW), :]
            acc_ref[...] += jnp.dot(patch.reshape(th * OW, patch.shape[-1]),
                                    w_ref[kh, kw],
                                    preferred_element_type=jnp.float32)
    y = acc_ref[...]
    if leaky:
        y = _leaky(y)
    o_ref[...] = y.reshape(1, th, OW, tc).astype(o_ref.dtype)


def conv2d(x, w, b, *, padding=0, leaky=False):
    """Stride-1 conv for the wide layers. x:[N,H,W,Cin] bf16, w:[KH,KW,Cin,Cout] bf16
    (HWIO), b:[Cout] f32."""
    N, H, W, Cin = x.shape
    KH, KW, _, Cout = w.shape
    OH = H + 2 * padding - KH + 1
    OW = W + 2 * padding - KW + 1
    xp = jnp.pad(x, ((0, 0), (padding, padding), (padding, padding), (0, 0)))
    Hp, Wp = H + 2 * padding, W + 2 * padding

    tc = _aligned_tile(Cout, 256, 128)                                # Cout tile
    th = _divisor_tile(OH, (256 * 1024) // max(1, OW * tc * 4))       # <=256KB acc

    kern = functools.partial(_conv_kernel, KH=KH, KW=KW, th=th, OW=OW, leaky=leaky)
    return pl.pallas_call(
        kern,
        out_shape=jax.ShapeDtypeStruct((N, OH, OW, Cout), _ACT_DTYPE),
        grid=(N, Cout // tc, OH // th),
        in_specs=[
            # full padded input for the current sample; constant over the inner
            # (Cout, row) axes -> fetched once per sample and kept VMEM-resident.
            pl.BlockSpec((1, Hp, Wp, Cin), lambda n, j, r: (n, 0, 0, 0)),
            pl.BlockSpec((KH, KW, Cin, tc), lambda n, j, r: (0, 0, 0, j)),
            pl.BlockSpec((1, tc), lambda n, j, r: (0, j)),
        ],
        out_specs=pl.BlockSpec((1, th, OW, tc), lambda n, j, r: (n, r, 0, j)),
        scratch_shapes=[pltpu.VMEM((th * OW, tc), jnp.float32)],
        compiler_params=_cp("parallel", "parallel", "parallel"),
    )(xp, w, b.reshape(1, Cout))


# ----------------------------- Linear / matmul kernel ------------------------
def _linear_kernel(x_ref, w_ref, b_ref, o_ref, acc_ref, *, act):
    @pl.when(pl.program_id(2) == 0)
    def _():
        acc_ref[...] = jnp.zeros_like(acc_ref)

    acc_ref[...] += jnp.dot(x_ref[...], w_ref[...],
                            preferred_element_type=jnp.float32)

    @pl.when(pl.program_id(2) == pl.num_programs(2) - 1)
    def _():
        y = acc_ref[...] + b_ref[...]
        if act == "leaky":
            y = _leaky(y)
        elif act == "sigmoid":
            y = 1.0 / (1.0 + jnp.exp(-y))
        o_ref[...] = y.astype(o_ref.dtype)


def linear(x, w, b, *, act="none", out_dtype=None):
    """Tiled (M, Fout, K) matmul + bias + optional activation.
    x:[M,K] bf16, w:[K,Fout] bf16, b:[Fout] f32."""
    M, K = x.shape
    _, Fout = w.shape
    out_dtype = out_dtype or x.dtype
    tm = _aligned_tile(M, 256, 8)
    tn = _aligned_tile(Fout, 256, 128)
    tk = _aligned_tile(K, 512, 128)
    return pl.pallas_call(
        functools.partial(_linear_kernel, act=act),
        out_shape=jax.ShapeDtypeStruct((M, Fout), out_dtype),
        grid=(M // tm, Fout // tn, K // tk),
        in_specs=[
            pl.BlockSpec((tm, tk), lambda i, j, k: (i, k)),
            pl.BlockSpec((tk, tn), lambda i, j, k: (k, j)),
            pl.BlockSpec((1, tn), lambda i, j, k: (0, j)),
        ],
        out_specs=pl.BlockSpec((tm, tn), lambda i, j, k: (i, j)),
        scratch_shapes=[pltpu.VMEM((tm, tn), jnp.float32)],
        compiler_params=_cp("parallel", "parallel", "arbitrary"),
    )(x, w, b.reshape(1, Fout))


def conv_im2col(x, w, b, *, stride, padding, leaky=False):
    """Conv via im2col in XLA + the tiled matmul kernel.  Used for the first conv
    (Cin=3, 7x7/s2 -> contraction dim 147) and the single stride-2 conv (tiny spatial
    map), so no strided ref indexing is ever needed inside a kernel."""
    N, H, W, Cin = x.shape
    KH, KW, _, Cout = w.shape
    OH = (H + 2 * padding - KH) // stride + 1
    OW = (W + 2 * padding - KW) // stride + 1
    Hp = stride * (OH - 1) + KH
    Wp = stride * (OW - 1) + KW
    xp = jnp.pad(x, ((0, 0), (padding, Hp - H - padding),
                     (padding, Wp - W - padding), (0, 0)))
    cols = [xp[:, kh:kh + stride * (OH - 1) + 1:stride,
               kw:kw + stride * (OW - 1) + 1:stride, :]
            for kh in range(KH) for kw in range(KW)]
    patches = jnp.concatenate(cols, axis=-1).reshape(N * OH * OW, KH * KW * Cin)
    y = linear(patches, w.reshape(KH * KW * Cin, Cout), b,
               act="leaky" if leaky else "none")
    return y.reshape(N, OH, OW, Cout)


# ----------------------------- MaxPool 2x2 kernel ----------------------------
def _pool_kernel(x_ref, o_ref, *, leaky):
    # x_ref: (1, thp, 2, Wo, 2, C); o_ref: (1, thp, Wo, C)
    x = x_ref[0]                                 # (thp, 2, Wo, 2, C)
    y = jnp.maximum(jnp.maximum(x[:, 0, :, 0, :], x[:, 0, :, 1, :]),
                    jnp.maximum(x[:, 1, :, 0, :], x[:, 1, :, 1, :]))
    if leaky:
        y = _leaky(y)
    o_ref[0] = y.astype(o_ref.dtype)


def maxpool2x2(x, *, leaky=False):
    """2x2 / stride-2 max pool (optionally fused LeakyReLU).  Pool phases are exposed
    by a free contiguous XLA reshape; in-kernel access is plain integer slicing (no
    strided ref indexing), C stays on the lane axis."""
    N, H, W, C = x.shape
    Ho, Wo = H // 2, W // 2
    xr = x.reshape(N, Ho, 2, Wo, 2, C)
    thp = _divisor_tile(Ho, (2 << 20) // max(1, 2 * W * C * x.dtype.itemsize))
    return pl.pallas_call(
        functools.partial(_pool_kernel, leaky=leaky),
        out_shape=jax.ShapeDtypeStruct((N, Ho, Wo, C), x.dtype),
        grid=(N, Ho // thp),
        in_specs=[pl.BlockSpec((1, thp, 2, Wo, 2, C),
                               lambda n, r: (n, r, 0, 0, 0, 0))],
        out_specs=pl.BlockSpec((1, thp, Wo, C), lambda n, r: (n, r, 0, 0)),
        compiler_params=_cp("parallel", "parallel"),
    )(xr)


# ----------------------------- BatchNorm kernels -----------------------------
def _bn_stats_kernel(x_ref, s_ref):
    # s_ref (resident): row 0 = per-channel sum, row 1 = per-channel sum of squares.
    @pl.when(pl.program_id(0) == 0)
    def _():
        s_ref[...] = jnp.zeros_like(s_ref)

    x = x_ref[...].astype(jnp.float32)
    s_ref[0:1, :] += jnp.sum(x, axis=0, keepdims=True)
    s_ref[1:2, :] += jnp.sum(x * x, axis=0, keepdims=True)


def _bn_apply_kernel(x_ref, s_ref, g_ref, b_ref, o_ref, *, inv_m, leaky):
    mean = s_ref[0:1, :] * inv_m
    var = s_ref[1:2, :] * inv_m - mean * mean        # biased (training-mode) variance
    scale = g_ref[...] * lax.rsqrt(var + _BN_EPS)
    shift = b_ref[...] - mean * scale
    y = x_ref[...].astype(jnp.float32) * scale + shift
    if leaky:
        y = _leaky(y)
    o_ref[...] = y.astype(o_ref.dtype)


def _batchnorm_rows(x2, gamma, beta, *, leaky):
    M, C = x2.shape
    tr = _aligned_tile(M, 2048, 8)
    grid = (M // tr,)
    stats = pl.pallas_call(
        _bn_stats_kernel,
        out_shape=jax.ShapeDtypeStruct((2, C), jnp.float32),
        grid=grid,
        in_specs=[pl.BlockSpec((tr, C), lambda r: (r, 0))],
        out_specs=pl.BlockSpec((2, C), lambda r: (0, 0)),
        compiler_params=_cp("arbitrary"),
    )(x2)
    return pl.pallas_call(
        functools.partial(_bn_apply_kernel, inv_m=1.0 / M, leaky=leaky),
        out_shape=jax.ShapeDtypeStruct((M, C), x2.dtype),
        grid=grid,
        in_specs=[pl.BlockSpec((tr, C), lambda r: (r, 0)),
                  pl.BlockSpec((2, C), lambda r: (0, 0)),
                  pl.BlockSpec((1, C), lambda r: (0, 0)),
                  pl.BlockSpec((1, C), lambda r: (0, 0))],
        out_specs=pl.BlockSpec((tr, C), lambda r: (r, 0)),
        compiler_params=_cp("parallel"),
    )(x2, stats, gamma, beta)


def batchnorm2d(x, gamma, beta, *, leaky=False):
    N, H, W, C = x.shape
    y = _batchnorm_rows(x.reshape(N * H * W, C), gamma, beta, leaky=leaky)
    return y.reshape(N, H, W, C)


def batchnorm1d(x, gamma, beta, *, leaky=False):
    return _batchnorm_rows(x, gamma, beta, leaky=leaky)


# ----------------------------- Model definition ------------------------------
# ("conv", cin, cout, k, stride, pad, fuse_leaky) | ("pool", fuse_leaky) | ("bn", C, fuse_leaky)
_FEATURES = [
    ("conv", 3, 64, 7, 2, 3, False), ("pool", False), ("bn", 64, True),
    ("conv", 64, 192, 3, 1, 1, False), ("pool", True),
    ("conv", 192, 128, 1, 1, 0, True),
    ("conv", 128, 256, 3, 1, 1, True),
    ("conv", 256, 256, 1, 1, 0, True),
    ("conv", 256, 512, 3, 1, 1, False), ("pool", False), ("bn", 512, True),
    ("conv", 512, 256, 1, 1, 0, True),
    ("conv", 256, 512, 3, 1, 1, True),
    ("conv", 512, 256, 1, 1, 0, True),
    ("conv", 256, 512, 3, 1, 1, True),
    ("conv", 512, 256, 1, 1, 0, True),
    ("conv", 256, 512, 3, 1, 1, True),
    ("conv", 512, 256, 1, 1, 0, True),
    ("conv", 256, 512, 3, 1, 1, True),
    ("conv", 512, 512, 1, 1, 0, True),
    ("conv", 512, 1024, 3, 1, 1, False), ("pool", False), ("bn", 1024, True),
    ("conv", 1024, 512, 1, 1, 0, True),
    ("conv", 512, 1024, 3, 1, 1, True),
    ("conv", 1024, 512, 1, 1, 0, True),
    ("conv", 512, 1024, 3, 1, 1, True),
    ("conv", 1024, 1024, 3, 1, 1, True),
    ("conv", 1024, 1024, 3, 2, 1, True),
    ("conv", 1024, 1024, 3, 1, 1, True),
    ("conv", 1024, 1024, 3, 1, 1, False), ("bn", 1024, True),
]


class Yolov1Pallas:
    def __init__(self, image_size, key):
        assert image_size % 64 == 0, "features stack downsamples spatial dims by 64"
        self.grid_size = image_size // 64
        gs = self.grid_size
        self.features_output_size = 1024 * gs * gs

        def conv_init(k, cin, cout, ksz):
            kw_, kb_ = jax.random.split(k)
            bound = 1.0 / math.sqrt(cin * ksz * ksz)
            w = jax.random.uniform(kw_, (ksz, ksz, cin, cout), jnp.float32,
                                   -bound, bound)
            b = jax.random.uniform(kb_, (cout,), jnp.float32, -bound, bound)
            return w.astype(_ACT_DTYPE), b

        def lin_init(k, fin, fout):
            kw_, kb_ = jax.random.split(k)
            bound = 1.0 / math.sqrt(fin)
            w = jax.random.uniform(kw_, (fin, fout), jnp.float32, -bound, bound)
            b = jax.random.uniform(kb_, (fout,), jnp.float32, -bound, bound)
            return w.astype(_ACT_DTYPE), b

        self.feat_params = []
        for op in _FEATURES:
            if op[0] == "conv":
                _, cin, cout, ksz, _, _, _ = op
                key, sub = jax.random.split(key)
                self.feat_params.append(conv_init(sub, cin, cout, ksz))
            elif op[0] == "bn":
                c = op[1]
                self.feat_params.append((jnp.ones((1, c), jnp.float32),
                                         jnp.zeros((1, c), jnp.float32)))
            else:
                self.feat_params.append(None)

        key, k1, k2, k3, k4 = jax.random.split(key, 5)
        self.fc_w, self.fc_b = lin_init(k1, self.features_output_size, 1024)
        self.bn1d_g = jnp.ones((1, 1024), jnp.float32)
        self.bn1d_b = jnp.zeros((1, 1024), jnp.float32)
        self.cls_w, self.cls_b = lin_init(k2, 1024, 20 * gs * gs)
        self.loc_w, self.loc_b = lin_init(k3, 1024, 4 * gs * gs)
        self.cnf_w, self.cnf_b = lin_init(k4, 1024, 1 * gs * gs)
        # fused prediction head: one lane-dense matmul, split after the kernel
        self.head_w = jnp.concatenate([self.loc_w, self.cnf_w, self.cls_w], axis=1)
        self.head_b = jnp.concatenate([self.loc_b, self.cnf_b, self.cls_b], axis=0)

    def __call__(self, x_nchw):
        # NCHW -> NHWC; bf16 activations between layers (f32 accumulation in-kernel)
        x = jnp.transpose(x_nchw, (0, 2, 3, 1)).astype(_ACT_DTYPE)
        for op, prm in zip(_FEATURES, self.feat_params):
            if op[0] == "conv":
                _, cin, _, _, stride, pad, lk = op
                if cin == 3 or stride != 1:
                    x = conv_im2col(x, prm[0], prm[1], stride=stride, padding=pad,
                                    leaky=lk)
                else:
                    x = conv2d(x, prm[0], prm[1], padding=pad, leaky=lk)
            elif op[0] == "pool":
                x = maxpool2x2(x, leaky=op[1])
            else:
                x = batchnorm2d(x, prm[0], prm[1], leaky=op[2])

        n = x.shape[0]
        gs = self.grid_size
        # match torch's x.view(-1, C*H*W) on an NCHW tensor (XLA layout glue)
        feat = jnp.transpose(x, (0, 3, 1, 2)).reshape(n, self.features_output_size)
        h = linear(feat, self.fc_w, self.fc_b, act="none")
        h = batchnorm1d(h, self.bn1d_g, self.bn1d_b, leaky=True)
        heads = linear(h, self.head_w, self.head_b, act="sigmoid",
                       out_dtype=jnp.float32)
        loc = heads[:, :4 * gs * gs].reshape(n, 4, gs, gs)
        cnf = heads[:, 4 * gs * gs:5 * gs * gs].reshape(n, 1, gs, gs)
        cls = heads[:, 5 * gs * gs:].reshape(n, 20, gs, gs)
        return loc, cnf, cls


if __name__ == "__main__":
    image_size = 64                      # smallest size the 64x downsampling allows
    key = jax.random.PRNGKey(0)
    key_model, key_input = jax.random.split(key)
    model = Yolov1Pallas(image_size, key_model)

    x = jax.random.normal(key_input, (2, 3, image_size, image_size), jnp.float32)
    loc, cnf, cls = model(x)
    (loc, cnf, cls) = jax.block_until_ready((loc, cnf, cls))

    gs = model.grid_size
    assert loc.shape == (2, 4, gs, gs)
    assert cnf.shape == (2, 1, gs, gs)
    assert cls.shape == (2, 20, gs, gs)
    assert bool(jnp.all(jnp.isfinite(loc))) and bool(jnp.all(jnp.isfinite(cls)))
    print("KERNEL_OK")
</pallas_src>

<mosaic_0001>
module attributes {stable_mosaic.version = 11 : i64} {
  func.func @_linear_kernel(%arg0: i32, %arg1: i32, %arg2: i32, %arg3: memref<256x147xbf16, #tpu.memory_space<vmem>>, %arg4: memref<147x64xbf16, #tpu.memory_space<vmem>>, %arg5: memref<1x64xf32, #tpu.memory_space<vmem>>, %arg6: memref<256x64xbf16, #tpu.memory_space<vmem>>, %arg7: memref<256x64xf32, #tpu.memory_space<vmem>>) attributes {dimension_semantics = [#tpu.dimension_semantics<parallel>, #tpu.dimension_semantics<parallel>, #tpu.dimension_semantics<arbitrary>], iteration_bounds = array<i64: 8, 1, 1>, scalar_prefetch = 0 : i64, scratch_operands = 1 : i64, tpu.core_type = #tpu.core_type<tc>, window_params = [{transform_indices = @transform_0, window_bounds = array<i64: 256, 147>}, {transform_indices = @transform_1, window_bounds = array<i64: 147, 64>}, {transform_indices = @transform_2, window_bounds = array<i64: 1, 64>}, {transform_indices = @transform_3, window_bounds = array<i64: 256, 64>}]} {
    %c0_i32 = arith.constant 0 : i32
    %0 = arith.cmpi eq, %arg2, %c0_i32 : i32
    %1 = arith.extui %0 : i1 to i32
    %c0_i32_0 = arith.constant 0 : i32
    %2 = arith.cmpi ne, %1, %c0_i32_0 : i32
    scf.if %2 {
      %cst_10 = arith.constant 0.000000e+00 : f32
      %12 = vector.broadcast %cst_10 : f32 to vector<256x64xf32>
      %c0_11 = arith.constant 0 : index
      %c0_12 = arith.constant 0 : index
      %13 = vector.load %arg7[%c0_11, %c0_12] : memref<256x64xf32, #tpu.memory_space<vmem>>, vector<256x64xf32>
      tpu.vector_store %arg7[%c0_11, %c0_12], %12 {strides = array<i32>} : memref<256x64xf32, #tpu.memory_space<vmem>>, vector<256x64xf32>,
    } else {
    }
    %c0 = arith.constant 0 : index
    %c0_1 = arith.constant 0 : index
    %3 = vector.load %arg7[%c0, %c0_1] : memref<256x64xf32, #tpu.memory_space<vmem>>, vector<256x64xf32>
    %c0_2 = arith.constant 0 : index
    %c0_3 = arith.constant 0 : index
    %4 = vector.load %arg3[%c0_2, %c0_3] : memref<256x147xbf16, #tpu.memory_space<vmem>>, vector<256x147xbf16>
    %c0_4 = arith.constant 0 : index
    %c0_5 = arith.constant 0 : index
    %5 = vector.load %arg4[%c0_4, %c0_5] : memref<147x64xbf16, #tpu.memory_space<vmem>>, vector<147x64xbf16>
    %cst = arith.constant dense<0.000000e+00> : vector<256x64xf32>
    %6 = tpu.matmul %4, %5, %cst {dimension_numbers = #tpu.dot_dimension_numbers<[1], [0], [0], [1], [0, 0, 1, 1], [], []>} : vector<256x147xbf16>, vector<147x64xbf16>, vector<256x64xf32> -> vector<256x64xf32>
    %7 = arith.addf %3, %6 : vector<256x64xf32>
    %c0_6 = arith.constant 0 : index
    %c0_7 = arith.constant 0 : index
    %8 = vector.load %arg7[%c0_6, %c0_7] : memref<256x64xf32, #tpu.memory_space<vmem>>, vector<256x64xf32>
    tpu.vector_store %arg7[%c0_6, %c0_7], %7 {strides = array<i32>} : memref<256x64xf32, #tpu.memory_space<vmem>>, vector<256x64xf32>,
    %c0_i32_8 = arith.constant 0 : i32
    %9 = arith.cmpi eq, %arg2, %c0_i32_8 : i32
    %10 = arith.extui %9 : i1 to i32
    %c0_i32_9 = arith.constant 0 : i32
    %11 = arith.cmpi ne, %10, %c0_i32_9 : i32
    scf.if %11 {
      %c0_10 = arith.constant 0 : index
      %c0_11 = arith.constant 0 : index
      %12 = vector.load %arg7[%c0_10, %c0_11] : memref<256x64xf32, #tpu.memory_space<vmem>>, vector<256x64xf32>
      %c0_12 = arith.constant 0 : index
      %c0_13 = arith.constant 0 : index
      %13 = vector.load %arg5[%c0_12, %c0_13] : memref<1x64xf32, #tpu.memory_space<vmem>>, vector<1x64xf32>
      %14 = vector.broadcast %13 : vector<1x64xf32> to vector<256x64xf32>
      %15 = arith.addf %12, %14 : vector<256x64xf32>
      %16 = arith.truncf %15 : vector<256x64xf32> to vector<256x64xbf16>
      %c0_14 = arith.constant 0 : index
      %c0_15 = arith.constant 0 : index
      %17 = vector.load %arg6[%c0_14, %c0_15] : memref<256x64xbf16, #tpu.memory_space<vmem>>, vector<256x64xbf16>
      tpu.vector_store %arg6[%c0_14, %c0_15], %16 {strides = array<i32>} : memref<256x64xbf16, #tpu.memory_space<vmem>>, vector<256x64xbf16>,
    } else {
    }
    return
  }
  func.func @transform_0(%arg0: i32, %arg1: i32, %arg2: i32) -> (i32, i32) {
    %c0_i32 = arith.constant 0 : i32
    return %arg0, %arg2 : i32, i32
  }
  func.func @transform_1(%arg0: i32, %arg1: i32, %arg2: i32) -> (i32, i32) {
    %c0_i32 = arith.constant 0 : i32
    return %arg2, %arg1 : i32, i32
  }
  func.func @transform_2(%arg0: i32, %arg1: i32, %arg2: i32) -> (i32, i32) {
    %c0_i32 = arith.constant 0 : i32
    %c0_i32_0 = arith.constant 0 : i32
    return %c0_i32, %arg1 : i32, i32
  }
  func.func @transform_3(%arg0: i32, %arg1: i32, %arg2: i32) -> (i32, i32) {
    %c0_i32 = arith.constant 0 : i32
    return %arg0, %arg1 : i32, i32
  }
}

</mosaic_0001>

<bundles_post_ra>
// kernel: tpu_custom_call.1
= control target key start
LH: loop header
LB: loop body
LE: loop exit
PB: predicated region body
PF: predicated region fallthrough
CT: control target
= control target key end

     0   :  { %s1457_s12 = smov 0   ;;  %s1459_s13 = smov 0   ;;  %s1779_s0 = inlined_call_operand.vmem [shape: bf16[2048,147], index: 0, kind: input, shape index: {}]   ;;  %s1780_s1 = inlined_call_operand.vmem [shape: bf16[147,64], index: 1, kind: input, shape index: {}]   ;;  %s1781_s2 = inlined_call_operand.vmem [shape: f32[1,64], index: 2, kind: input, shape index: {}]   ;;  %s1782_s3 = inlined_call_operand.vmem [shape: bf16[2048,64], index: 3, kind: output, shape index: {}]  }
   0x1   :  { %s1461_s14 = smov 0  }
   0x2 LB: > { %s32_s15 = sadd.s32 1, %s1429_s13  ;;  %p1144_p0 = scmp.ge.s32.totalorder %s1433_s14, 1  ;;  %s1433_s14 = sphi %s1461_s14, %s13_s14   ;;  %s1429_s13 = sphi %s1459_s13, %s1784_s13   ;;  %s1425_s12 = sphi %s1457_s12, %s1783_s12  }
   0x3   : > { %p34_p1 = scmp.ge.s32.totalorder %s32_s15, 8  ;;  %p191_p2 = scmp.lt.s32.totalorder %s1433_s14, 9 }
   0x5   : > { %s1786_s15 = smov (%p34_p1, %s32_s15), 0  ;;  %p192_p3 = pnand %p1144_p0, %p191_p2 }
   0x6   : > { %s1145_s20 = sshll.u32 (!%p192_p3), %s1425_s12, 5 }
   0x7   : > { %195 = sbr.rel (%p192_p3) target bundleno = 313 (0x139), region = 32  ;;  %p236_p4 = scmp.lt.s32.totalorder (!%p192_p3), %s1145_s20, 255 }
   0xc   : > { %v1372_v0 = vld [vmem:[%s1780_s1 + $0x38] sm:$0xff]  ;;  %v387_v1 = vld [vmem:[%s1780_s1 + $0x48] sm:$0x3]  ;;  %vm638_vm0 = vcmask 1040384   ;;  %vm639_vm1 = vcmask 1041408   ;;  %v1371_v3 = vld [vmem:[%s1780_s1 + $0x30] sm:$0xff] }
   0xd   : > { %v569_v2 = vunpack.c.l.b16 %v387_v1  ;;  %645 = vmatpush.bf16.msra.mxu0 %v1372_v0  ;;  %1374 = vmatpush.bf16.msra.mxu2 %v1372_v0  ;;  %v1435_v4 = vmov 65535   ;;  %s1788_s20 = smov (!%p236_p4, %s1145_s20), 255  ;;  %v1370_v9 = vld [vmem:[%s1780_s1 + $0x28] sm:$0xff]  ;;  %v1373_v10 = vld [vmem:[%s1780_s1 + $0x40] sm:$0xff]  ;;  %vm589_vm2 = vcmask 154624   ;;  %v1368_v18 = vld [vmem:[%s1780_s1 + $0x18] sm:$0xff] }
   0xe   : > { %v640_v5 = vsel %vm638_vm0, 4294967295, %v1435_v4  ;;  %s1332_s25 = sshll.u32 %s1788_s20, 3  ;;  %v1369_v14 = vld [vmem:[%s1780_s1 + $0x20] sm:$0xff]  ;;  %v1367_v19 = vld [vmem:[%s1780_s1 + $0x10] sm:$0xff]  ;;  %v1366_v20 = vld [vmem:[%s1780_s1 + $0x8] sm:$0xff]  ;;  %vm272_vm3 = vcmask 523264  }
   0xf   : > { %v579_v6 = vpack.c.b16 %v569_v2, %v569_v2  ;;  %v641_v7 = vsel %vm639_vm1, %v640_v5, 0  ;;  %s1496_s30 = scalar_lea.vmem %s1779_s0, %s1332_s25  ;;  %v1365_v26 = vld [vmem:[%s1780_s1] sm:$0xff]  ;;  %s1149_s19 = sshll.u32 %s1788_s20, 2  ;;  %vm991_vm4 = vcmask 519168  }
  0x10   : > { %v1333_v11 = vld [vmem:[%s1496_s30 + $0x4] sm:$0xf]  ;;  %v1154_v12 = vld [vmem:[%s1496_s30 + $0x8] sm:$0xf0]  ;;  %v1351_v15 = vld [vmem:[%s1496_s30 + $0x94] sm:$0xf]  ;;  %s1639_s23 = scalar_lea.vmem %s1782_s3, %s1149_s19 }
  0x11   : > { %v643_v8 = vand.u32 %v641_v7, %v579_v6  ;;  %646 = vmatpush.bf16.msra.mxu0 %v1371_v3  ;;  %1375 = vmatpush.bf16.msra.mxu2 %v1371_v3  ;;  %v1157_v13 = vor.u32 %v1333_v11, %v1154_v12  ;;  %v1226_v16 = vld [vmem:[%s1496_s30 + $0x98] sm:$0xf0]  ;;  %v1335_v21 = vld [vmem:[%s1496_s30 + $0x14] sm:$0xf]  ;;  %v1353_v23 = vld [vmem:[%s1496_s30 + $0xa4] sm:$0xf] }
  0x12   : > { %v1229_v17 = vor.u32 %v1351_v15, %v1226_v16  ;;  %v1162_v22 = vld [vmem:[%s1496_s30 + $0x18] sm:$0xf0]  ;;  %v1234_v24 = vld [vmem:[%s1496_s30 + $0xa8] sm:$0xf0]  ;;  %v1152_v27 = vld [vmem:[%s1496_s30] sm:$0xf] }
  0x13   : > { %740 = vmatpush.bf16.msra.mxu1 %v643_v8  ;;  %1382 = vmatpush.bf16.msra.mxu3 %v643_v8  ;;  %v1165_v25 = vor.u32 %v1335_v21, %v1162_v22  ;;  %v1334_v28 = vld [vmem:[%s1496_s30 + $0x4] sm:$0xf0]  ;;  %v1216_v29 = vld [vmem:[%s1496_s30 + $0x80] sm:$0xf]  ;;  %v1237_v31 = vor.u32 %v1353_v23, %v1234_v24  ;;  %v1337_v34 = vld [vmem:[%s1496_s30 + $0x24] sm:$0xf] }
  0x14   : > { %v1350_v30 = vld [vmem:[%s1496_s30 + $0x84] sm:$0xf0]  ;;  %v1153_v32 = vor.u32 %v1334_v28, %v1152_v27  ;;  %v1170_v35 = vld [vmem:[%s1496_s30 + $0x28] sm:$0xf0]  ;;  %v1355_v36 = vld [vmem:[%s1496_s30 + $0xb4] sm:$0xf] }
  0x15   : > { %647 = vmatpush.bf16.msra.mxu0 %v1370_v9  ;;  %1376 = vmatpush.bf16.msra.mxu2 %v1370_v9  ;;  %v1217_v33 = vor.u32 %v1350_v30, %v1216_v29  ;;  %v1242_v37 = vld [vmem:[%s1496_s30 + $0xb8] sm:$0xf0]  ;;  %v1173_v38 = vor.u32 %v1337_v34, %v1170_v35  ;;  %v1160_v39 = vld [vmem:[%s1496_s30 + $0x10] sm:$0xf]  ;;  %v1336_v40 = vld [vmem:[%s1496_s30 + $0x14] sm:$0xf0] }
  0x16   : > { %v1224_v41 = vld [vmem:[%s1496_s30 + $0x90] sm:$0xf]  ;;  %v1352_v42 = vld [vmem:[%s1496_s30 + $0x94] sm:$0xf0]  ;;  %v1245_v43 = vor.u32 %v1355_v36, %v1242_v37  ;;  %v1161_v44 = vor.u32 %v1336_v40, %v1160_v39  ;;  %v1339_v46 = vld [vmem:[%s1496_s30 + $0x34] sm:$0xf] }
  0x17   : > { %741 = vmatpush.bf16.msra.mxu1 %v1373_v10  ;;  %1383 = vmatpush.bf16.msra.mxu3 %v1373_v10  ;;  %v1225_v45 = vor.u32 %v1352_v42, %v1224_v41  ;;  %v1178_v47 = vld [vmem:[%s1496_s30 + $0x38] sm:$0xf0]  ;;  %v1357_v48 = vld [vmem:[%s1496_s30 + $0xc4] sm:$0xf]  ;;  %v1250_v49 = vld [vmem:[%s1496_s30 + $0xc8] sm:$0xf0] }
  0x18   : > { %v1181_v50 = vor.u32 %v1339_v46, %v1178_v47  ;;  %v1168_v51 = vld [vmem:[%s1496_s30 + $0x20] sm:$0xf]  ;;  %v1338_v52 = vld [vmem:[%s1496_s30 + $0x24] sm:$0xf0]  ;;  %v1253_v55 = vor.u32 %v1357_v48, %v1250_v49  ;;  %v1341_v58 = vld [vmem:[%s1496_s30 + $0x44] sm:$0xf] }
  0x19   : > { %648 = vmatpush.bf16.msra.mxu0 %v1369_v14  ;;  %1377 = vmatpush.bf16.msra.mxu2 %v1369_v14  ;;  %v1232_v53 = vld [vmem:[%s1496_s30 + $0xa0] sm:$0xf]  ;;  %v1354_v54 = vld [vmem:[%s1496_s30 + $0xa4] sm:$0xf0]  ;;  %v1169_v56 = vor.u32 %v1338_v52, %v1168_v51  ;;  %v1186_v59 = vld [vmem:[%s1496_s30 + $0x48] sm:$0xf0] }
  0x1a   : > { %1314 = vmatmul.msk.bf16.vlgmr.msra.gmra.mxu1 %vm589_vm2, %v1157_v13  ;;  %1323 = vmatmul.msk.bf16.vlgmr.msra.gmra.mxu3 %vm589_vm2, %v1229_v17  ;;  %v1233_v57 = vor.u32 %v1354_v54, %v1232_v53  ;;  %v1359_v60 = vld [vmem:[%s1496_s30 + $0xd4] sm:$0xf]  ;;  %v1258_v61 = vld [vmem:[%s1496_s30 + $0xd8] sm:$0xf0]  ;;  %v1189_v62 = vor.u32 %v1341_v58, %v1186_v59  ;;  %v1176_v63 = vld [vmem:[%s1496_s30 + $0x30] sm:$0xf] }
  0x1b   : > { %v1340_v0 = vld [vmem:[%s1496_s30 + $0x34] sm:$0xf0]  ;;  %v1240_v1 = vld [vmem:[%s1496_s30 + $0xb0] sm:$0xf]  ;;  %v1261_v3 = vor.u32 %v1359_v60, %v1258_v61  ;;  %v1343_v6 = vld [vmem:[%s1496_s30 + $0x54] sm:$0xf] }
  0x1c   : > { %v1356_v2 = vld [vmem:[%s1496_s30 + $0xb4] sm:$0xf0]  ;;  %v1177_v4 = vor.u32 %v1340_v0, %v1176_v63  ;;  %v1194_v7 = vld [vmem:[%s1496_s30 + $0x58] sm:$0xf0]  ;;  %v1361_v8 = vld [vmem:[%s1496_s30 + $0xe4] sm:$0xf] }
  0x1d   : > { %649 = vmatpush.bf16.msra.mxu0 %v1368_v18  ;;  %1378 = vmatpush.bf16.msra.mxu2 %v1368_v18  ;;  %v1241_v5 = vor.u32 %v1356_v2, %v1240_v1  ;;  %v1266_v9 = vld [vmem:[%s1496_s30 + $0xe8] sm:$0xf0]  ;;  %v1197_v10 = vor.u32 %v1343_v6, %v1194_v7  ;;  %v1184_v11 = vld [vmem:[%s1496_s30 + $0x40] sm:$0xf]  ;;  %v1342_v12 = vld [vmem:[%s1496_s30 + $0x44] sm:$0xf0] }
  0x1e   : > { %v1248_v13 = vld [vmem:[%s1496_s30 + $0xc0] sm:$0xf]  ;;  %v1358_v14 = vld [vmem:[%s1496_s30 + $0xc4] sm:$0xf0]  ;;  %v1269_v15 = vor.u32 %v1361_v8, %v1266_v9  ;;  %v1185_v16 = vor.u32 %v1342_v12, %v1184_v11  ;;  %v1345_v18 = vld [vmem:[%s1496_s30 + $0x64] sm:$0xf] }
  0x1f   : > { %v1249_v17 = vor.u32 %v1358_v14, %v1248_v13  ;;  %v1274_v21 = vld [vmem:[%s1496_s30 + $0xf8] sm:$0xf0]  ;;  %v1192_v23 = vld [vmem:[%s1496_s30 + $0x50] sm:$0xf]  ;;  %v1344_v24 = vld [vmem:[%s1496_s30 + $0x54] sm:$0xf0] }
  0x20   : > { %v1193_v28 = vor.u32 %v1344_v24, %v1192_v23  ;;  %v1347_v30 = vld [vmem:[%s1496_s30 + $0x74] sm:$0xf]  ;;  %v1346_v34 = vld [vmem:[%s1496_s30 + $0x64] sm:$0xf0]  ;;  %v1436_v35 = vmov 0.0  }
  0x21   : > { %650 = vmatpush.bf16.msra.mxu0 %v1367_v19  ;;  %1379 = vmatpush.bf16.msra.mxu2 %v1367_v19  ;;  %v1202_v19 = vld [vmem:[%s1496_s30 + $0x68] sm:$0xf0]  ;;  %273 = vst.msk [vmem:[#allocation2] sm:$0xff] %vm272_vm3, %v1436_v35  ;;  %v1264_v36 = vld [vmem:[%s1496_s30 + $0xe0] sm:$0xf] }
  0x22   : > { %v1205_v22 = vor.u32 %v1345_v18, %v1202_v19  ;;  %v1362_v37 = vld [vmem:[%s1496_s30 + $0xe4] sm:$0xf0]  ;;  %274 = vst.msk [vmem:[#allocation2 + $0x8] sm:$0xff] %vm272_vm3, %v1436_v35  ;;  %v1349_v40 = vld [vmem:[%s1496_s30 + $0x84] sm:$0xf] }
  0x23   : > { %275 = vst.msk [vmem:[#allocation2 + $0x10] sm:$0xff] %vm272_vm3, %v1436_v35  ;;  %v1265_v39 = vor.u32 %v1362_v37, %v1264_v36  ;;  %v1218_v41 = vld [vmem:[%s1496_s30 + $0x88] sm:$0xf0]  ;;  %v1272_v46 = vld [vmem:[%s1496_s30 + $0xf0] sm:$0xf] }
  0x24   : > { %276 = vst.msk [vmem:[#allocation2 + $0x18] sm:$0xff] %vm272_vm3, %v1436_v35  ;;  %v1221_v42 = vor.u32 %v1349_v40, %v1218_v41  ;;  %v1364_v47 = vld [vmem:[%s1496_s30 + $0xf4] sm:$0xf0] }
  0x25   : > { %651 = vmatpush.bf16.msra.mxu0 %v1366_v20  ;;  %1380 = vmatpush.bf16.msra.mxu2 %v1366_v20  ;;  %v1363_v20 = vld [vmem:[%s1496_s30 + $0xf4] sm:$0xf]  ;;  %277 = vst.msk [vmem:[#allocation2 + $0x20] sm:$0xff] %vm272_vm3, %v1436_v35  ;;  %v1273_v49 = vor.u32 %v1364_v47, %v1272_v46 }
  0x26   : > { %v1277_v27 = vor.u32 %v1363_v20, %v1274_v21  ;;  %278 = vst.msk [vmem:[#allocation2 + $0x28] sm:$0xff] %vm272_vm3, %v1436_v35 }
  0x27   : > { %279 = vst.msk [vmem:[#allocation2 + $0x30] sm:$0xff] %vm272_vm3, %v1436_v35 }
  0x28   : > { %280 = vst.msk [vmem:[#allocation2 + $0x38] sm:$0xff] %vm272_vm3, %v1436_v35  ;;  %v305_v53 = vld [vmem:[#allocation2] sm:$0xff] }
  0x29   : > { %652 = vmatpush.bf16.msra.mxu0 %v1365_v26  ;;  %1381 = vmatpush.bf16.msra.mxu2 %v1365_v26  ;;  %v1360_v26 = vld [vmem:[%s1496_s30 + $0xd4] sm:$0xf0]  ;;  %281 = vst.msk [vmem:[#allocation2 + $0x40] sm:$0xff] %vm272_vm3, %v1436_v35  ;;  %v306_v60 = vld [vmem:[#allocation2 + $0x8] sm:$0xff] }
  0x2a   : > { %1315 = vmatmul.msk.bf16.gmra.mxu1 %vm589_vm2, %v1165_v25  ;;  %1324 = vmatmul.msk.bf16.gmra.mxu3 %vm589_vm2, %v1237_v31  ;;  %v1256_v25 = vld [vmem:[%s1496_s30 + $0xd0] sm:$0xf]  ;;  %v1210_v31 = vld [vmem:[%s1496_s30 + $0x78] sm:$0xf0]  ;;  %282 = vst.msk [vmem:[#allocation2 + $0x48] sm:$0xff] %vm272_vm3, %v1436_v35 }
  0x2b   : > { %v1257_v29 = vor.u32 %v1360_v26, %v1256_v25  ;;  %283 = vst.msk [vmem:[#allocation2 + $0x50] sm:$0xff] %vm272_vm3, %v1436_v35  ;;  %v307_v6 = vld [vmem:[#allocation2 + $0x10] sm:$0xff]  ;;  %v308_v18 = vld [vmem:[#allocation2 + $0x18] sm:$0xff] }
  0x2c   : > { %653 = vmatmul.bf16.vlgmr.msra.gmra.mxu0 %v1153_v32  ;;  %693 = vmatmul.bf16.vlgmr.msra.gmra.mxu2 %v1217_v33  ;;  %v1213_v32 = vor.u32 %v1347_v30, %v1210_v31  ;;  %v1200_v33 = vld [vmem:[%s1496_s30 + $0x60] sm:$0xf]  ;;  %284 = vst.msk [vmem:[#allocation2 + $0x58] sm:$0xff] %vm272_vm3, %v1436_v35 }
  0x2d   : > { %285 = vst.msk [vmem:[#allocation2 + $0x60] sm:$0xff] %vm272_vm3, %v1436_v35  ;;  %v309_v31 = vld [vmem:[#allocation2 + $0x20] sm:$0xff]  ;;  %v310_v47 = vld [vmem:[#allocation2 + $0x28] sm:$0xff] }
  0x2e   : > { %286 = vst.msk [vmem:[#allocation2 + $0x68] sm:$0xff] %vm272_vm3, %v1436_v35 }
  0x2f   : > { %287 = vst.msk [vmem:[#allocation2 + $0x70] sm:$0xff] %vm272_vm3, %v1436_v35 }
  0x30   : > { %288 = vst.msk [vmem:[#allocation2 + $0x78] sm:$0xff] %vm272_vm3, %v1436_v35 }
  0x31   : > { %289 = vst.msk [vmem:[#allocation2 + $0x80] sm:$0xff] %vm272_vm3, %v1436_v35 }
  0x32   : > { %290 = vst.msk [vmem:[#allocation2 + $0x88] sm:$0xff] %vm272_vm3, %v1436_v35 }
  0x33   : > { %291 = vst.msk [vmem:[#allocation2 + $0x90] sm:$0xff] %vm272_vm3, %v1436_v35 }
  0x34   : > { %292 = vst.msk [vmem:[#allocation2 + $0x98] sm:$0xff] %vm272_vm3, %v1436_v35 }
  0x35   : > { %293 = vst.msk [vmem:[#allocation2 + $0xa0] sm:$0xff] %vm272_vm3, %v1436_v35 }
  0x36   : > { %294 = vst.msk [vmem:[#allocation2 + $0xa8] sm:$0xff] %vm272_vm3, %v1436_v35 }
  0x37   : > { %295 = vst.msk [vmem:[#allocation2 + $0xb0] sm:$0xff] %vm272_vm3, %v1436_v35 }
  0x38   : > { %296 = vst.msk [vmem:[#allocation2 + $0xb8] sm:$0xff] %vm272_vm3, %v1436_v35 }
  0x39   : > { %297 = vst.msk [vmem:[#allocation2 + $0xc0] sm:$0xff] %vm272_vm3, %v1436_v35 }
  0x3a   : > { %1316 = vmatmul.msk.bf16.gmra.mxu1 %vm589_vm2, %v1173_v38  ;;  %1325 = vmatmul.msk.bf16.gmra.mxu3 %vm589_vm2, %v1245_v43  ;;  %v1201_v38 = vor.u32 %v1346_v34, %v1200_v33  ;;  %v1208_v43 = vld [vmem:[%s1496_s30 + $0x70] sm:$0xf]  ;;  %298 = vst.msk [vmem:[#allocation2 + $0xc8] sm:$0xff] %vm272_vm3, %v1436_v35 }
  0x3b   : > { %299 = vst.msk [vmem:[#allocation2 + $0xd0] sm:$0xff] %vm272_vm3, %v1436_v35 }
  0x3c   : > { %658 = vmatmul.bf16.gmra.mxu0 %v1161_v44  ;;  %698 = vmatmul.bf16.gmra.mxu2 %v1225_v45  ;;  %v1348_v44 = vld [vmem:[%s1496_s30 + $0x74] sm:$0xf0]  ;;  %300 = vst.msk [vmem:[#allocation2 + $0xd8] sm:$0xff] %vm272_vm3, %v1436_v35 }
  0x3d   : > { %v1209_v48 = vor.u32 %v1348_v44, %v1208_v43  ;;  %301 = vst.msk [vmem:[#allocation2 + $0xe0] sm:$0xff] %vm272_vm3, %v1436_v35  ;;  %v325_v44 = vld [vmem:[#allocation2 + $0xa0] sm:$0xff] }
  0x3e   : > { %302 = vst.msk [vmem:[#allocation2 + $0xe8] sm:$0xff] %vm272_vm3, %v1436_v35 }
  0x3f   : > { %303 = vst.msk [vmem:[#allocation2 + $0xf0] sm:$0xff] %vm272_vm3, %v1436_v35 }
  0x40   : > { %304 = vst.msk [vmem:[#allocation2 + $0xf8] sm:$0xff] %vm272_vm3, %v1436_v35 }
  0x4a   : > { %1317 = vmatmul.msk.bf16.gmra.mxu1 %vm589_vm2, %v1181_v50  ;;  %1326 = vmatmul.msk.bf16.gmra.mxu3 %vm589_vm2, %v1253_v55 }
  0x4c   : > { %663 = vmatmul.bf16.gmra.mxu0 %v1169_v56  ;;  %703 = vmatmul.bf16.gmra.mxu2 %v1233_v57 }
  0x5a   : > { %1318 = vmatmul.msk.bf16.gmra.mxu1 %vm589_vm2, %v1189_v62  ;;  %1327 = vmatmul.msk.bf16.gmra.mxu3 %vm589_vm2, %v1261_v3  ;;  %v1631_v62 = vld [vmem:[%s1781_s2] ss:$0 sm:$0xff] }
  0x5c   : > { %668 = vmatmul.bf16.gmra.mxu0 %v1177_v4  ;;  %708 = vmatmul.bf16.gmra.mxu2 %v1241_v5 }
  0x6a   : > { %1319 = vmatmul.msk.bf16.gmra.mxu1 %vm589_vm2, %v1197_v10  ;;  %1328 = vmatmul.msk.bf16.gmra.mxu3 %vm589_vm2, %v1269_v15  ;;  %v323_v15 = vld [vmem:[#allocation2 + $0x90] sm:$0xff] }
  0x6c   : > { %673 = vmatmul.bf16.gmra.mxu0 %v1185_v16  ;;  %713 = vmatmul.bf16.gmra.mxu2 %v1249_v17 }
  0x7a   : > { %1320 = vmatmul.msk.bf16.gmra.mxu1 %vm589_vm2, %v1205_v22  ;;  %1329 = vmatmul.msk.bf16.gmra.mxu3 %vm589_vm2, %v1277_v27 }
  0x7c   : > { %678 = vmatmul.bf16.gmra.mxu0 %v1193_v28  ;;  %718 = vmatmul.bf16.gmra.mxu2 %v1257_v29  ;;  %v324_v28 = vld [vmem:[#allocation2 + $0x98] sm:$0xff] }
  0x8a   : > { %1321 = vmatmul.msk.bf16.gmra.mxu1 %vm589_vm2, %v1213_v32 }
  0x8c   : > { %683 = vmatmul.bf16.gmra.mxu0 %v1201_v38  ;;  %723 = vmatmul.bf16.gmra.mxu2 %v1265_v39 }
  0x97   : > { %v743_v45 = vpop.f32.mrf.mxu1 }
  0x9a   : > { %1322 = vmatmul.msk.bf16.gmra.mxu1 %vm589_vm2, %v1221_v42 }
  0x9c   : > { %688 = vmatmul.bf16.gmra.mxu0 %v1209_v48  ;;  %728 = vmatmul.bf16.gmra.mxu2 %v1273_v49 }
  0x9d   : > { %v788_v52 = vpop.f32.mrf.mxu3 }
  0x9f   : > { %v745_v50 = vpop.f32.mrf.mxu1 }
  0xa5   : > { %v790_v59 = vpop.f32.mrf.mxu3 }
  0xa7   : > { %v748_v51 = vpop.f32.mrf.mxu1 }
  0xa9   : > { %v654_v54 = vpop.f32.mrf.mxu0 }
  0xaa   : > { %v744_v55 = vadd.f32 %v743_v45, %v654_v54 }
  0xac   : > { %v823_v56 = vadd.f32 %v744_v55, %v305_v53 }
  0xad   : > { %v793_v9 = vpop.f32.mrf.mxu3 }
  0xae   : > { %856 = vst.msk [vmem:[#allocation2] sm:$0xff] %vm272_vm3, %v823_v56 }
  0xaf   : > { %v750_v57 = vpop.f32.mrf.mxu1  ;;  %v1626_v58 = vpop.f32.mrf.mxu2 }
  0xb1   : > { %v656_v61 = vpop.f32.mrf.mxu0 }
  0xb2   : > { %v746_v63 = vadd.f32 %v745_v50, %v656_v61 }
  0xb4   : > { %v824_v0 = vadd.f32 %v746_v63, %v306_v60  ;;  %v326_v60 = vld [vmem:[#allocation2 + $0xa8] sm:$0xff] }
  0xb5   : > { %v891_v1 = vld [vmem:[#allocation2] sm:$0xff]  ;;  %v795_v23 = vpop.f32.mrf.mxu3 }
  0xb6   : > { %v927_v2 = vadd.f32 %v1631_v62, %v891_v1  ;;  %857 = vst.msk [vmem:[#allocation2 + $0x8] sm:$0xff] %vm272_vm3, %v824_v0  ;;  %v311_v1 = vld [vmem:[#allocation2 + $0x30] sm:$0xff] }
  0xb7   : > { %v753_v3 = vpop.f32.mrf.mxu1  ;;  %v1641_v5 = vpop.f32.mrf.mxu2 }
  0xb8   : > { %v959_v4 = vpack.c.bf16 %v927_v2, %v927_v2 }
  0xb9   : > { %v659_v7 = vpop.f32.mrf.mxu0 }
  0xba   : > { %992 = vst.msk [vmem:[%s1639_s23] sm:$0xf] %vm991_vm4, %v959_v4  ;;  %v749_v8 = vadd.f32 %v748_v51, %v659_v7 }
  0xbc   : > { %v825_v10 = vadd.f32 %v749_v8, %v307_v6 }
  0xbd   : > { %v892_v11 = vld [vmem:[#allocation2 + $0x8] sm:$0xff]  ;;  %v798_v41 = vpop.f32.mrf.mxu3 }
  0xbe   : > { %v928_v12 = vadd.f32 %v1631_v62, %v892_v11  ;;  %858 = vst.msk [vmem:[#allocation2 + $0x10] sm:$0xff] %vm272_vm3, %v825_v10 }
  0xbf   : > { %v755_v13 = vpop.f32.mrf.mxu1  ;;  %v699_v16 = vpop.f32.mrf.mxu2 }
  0xc0   : > { %v960_v14 = vpack.c.bf16 %v928_v12, %v928_v12  ;;  %v789_v17 = vadd.f32 %v788_v52, %v699_v16 }
  0xc1   : > { %v661_v19 = vpop.f32.mrf.mxu0 }
  0xc2   : > { %993 = vst.msk [vmem:[%s1639_s23 + $0x4] sm:$0xf] %vm991_vm4, %v960_v14  ;;  %v751_v20 = vadd.f32 %v750_v57, %v661_v19  ;;  %v841_v21 = vadd.f32 %v789_v17, %v323_v15  ;;  %v327_v14 = vld [vmem:[#allocation2 + $0xb0] sm:$0xff]  ;;  %v312_v17 = vld [vmem:[#allocation2 + $0x38] sm:$0xff] }
  0xc4   : > { %v826_v22 = vadd.f32 %v751_v20, %v308_v18  ;;  %874 = vst.msk [vmem:[#allocation2 + $0x90] sm:$0xff] %vm272_vm3, %v841_v21 }
  0xc5   : > { %v893_v24 = vld [vmem:[#allocation2 + $0x10] sm:$0xff]  ;;  %v800_v63 = vpop.f32.mrf.mxu3 }
  0xc6   : > { %v929_v25 = vadd.f32 %v1631_v62, %v893_v24  ;;  %859 = vst.msk [vmem:[#allocation2 + $0x18] sm:$0xff] %vm272_vm3, %v826_v22 }
  0xc7   : > { %v758_v26 = vpop.f32.mrf.mxu1  ;;  %v701_v29 = vpop.f32.mrf.mxu2 }
  0xc8   : > { %v961_v27 = vpack.c.bf16 %v929_v25, %v929_v25  ;;  %v791_v30 = vadd.f32 %v790_v59, %v701_v29 }
  0xc9   : > { %v664_v32 = vpop.f32.mrf.mxu0 }
  0xca   : > { %994 = vst.msk [vmem:[%s1639_s23 + $0x8] sm:$0xf] %vm991_vm4, %v961_v27  ;;  %v754_v33 = vadd.f32 %v753_v3, %v664_v32  ;;  %v842_v34 = vadd.f32 %v791_v30, %v324_v28  ;;  %v328_v30 = vld [vmem:[#allocation2 + $0xb8] sm:$0xff] }
  0xcb   : > { %v909_v35 = vld [vmem:[#allocation2 + $0x90] sm:$0xff] }
  0xcc   : > { %v827_v36 = vadd.f32 %v754_v33, %v309_v31  ;;  %v945_v37 = vadd.f32 %v1631_v62, %v909_v35  ;;  %875 = vst.msk [vmem:[#allocation2 + $0x98] sm:$0xff] %vm272_vm3, %v842_v34  ;;  %v313_v33 = vld [vmem:[#allocation2 + $0x40] sm:$0xff] }
  0xcd   : > { %v894_v38 = vld [vmem:[#allocation2 + $0x18] sm:$0xff]  ;;  %v803_v20 = vpop.f32.mrf.mxu3 }
  0xce   : > { %v930_v39 = vadd.f32 %v1631_v62, %v894_v38  ;;  %860 = vst.msk [vmem:[#allocation2 + $0x20] sm:$0xff] %vm272_vm3, %v827_v36  ;;  %v977_v42 = vpack.c.bf16 %v945_v37, %v945_v37 }
  0xcf   : > { %v760_v40 = vpop.f32.mrf.mxu1  ;;  %v704_v45 = vpop.f32.mrf.mxu2 }
  0xd0   : > { %v962_v43 = vpack.c.bf16 %v930_v39, %v930_v39  ;;  %1010 = vst.msk [vmem:[%s1639_s23 + $0x48] sm:$0xf] %vm991_vm4, %v977_v42  ;;  %v794_v46 = vadd.f32 %v793_v9, %v704_v45 }
  0xd1   : > { %v666_v48 = vpop.f32.mrf.mxu0 }
  0xd2   : > { %995 = vst.msk [vmem:[%s1639_s23 + $0xc] sm:$0xf] %vm991_vm4, %v962_v43  ;;  %v756_v49 = vadd.f32 %v755_v13, %v666_v48  ;;  %v843_v50 = vadd.f32 %v794_v46, %v325_v44  ;;  %v329_v46 = vld [vmem:[#allocation2 + $0xc0] sm:$0xff] }
  0xd3   : > { %v910_v51 = vld [vmem:[#allocation2 + $0x98] sm:$0xff] }
  0xd4   : > { %v828_v52 = vadd.f32 %v756_v49, %v310_v47  ;;  %v946_v53 = vadd.f32 %v1631_v62, %v910_v51  ;;  %876 = vst.msk [vmem:[#allocation2 + $0xa0] sm:$0xff] %vm272_vm3, %v843_v50  ;;  %v314_v49 = vld [vmem:[#allocation2 + $0x48] sm:$0xff] }
  0xd5   : > { %v895_v54 = vld [vmem:[#allocation2 + $0x20] sm:$0xff]  ;;  %v805_v39 = vpop.f32.mrf.mxu3 }
  0xd6   : > { %v931_v55 = vadd.f32 %v1631_v62, %v895_v54  ;;  %861 = vst.msk [vmem:[#allocation2 + $0x28] sm:$0xff] %vm272_vm3, %v828_v52  ;;  %v978_v57 = vpack.c.bf16 %v946_v53, %v946_v53 }
  0xd7   : > { %v763_v56 = vpop.f32.mrf.mxu1  ;;  %v706_v61 = vpop.f32.mrf.mxu2 }
  0xd8   : > { %v963_v59 = vpack.c.bf16 %v931_v55, %v931_v55  ;;  %1011 = vst.msk [vmem:[%s1639_s23 + $0x4c] sm:$0xf] %vm991_vm4, %v978_v57  ;;  %v796_v0 = vadd.f32 %v795_v23, %v706_v61 }
  0xd9   : > { %v669_v2 = vpop.f32.mrf.mxu0 }
  0xda   : > { %996 = vst.msk [vmem:[%s1639_s23 + $0x10] sm:$0xf] %vm991_vm4, %v963_v59  ;;  %v759_v3 = vadd.f32 %v758_v26, %v669_v2  ;;  %v844_v4 = vadd.f32 %v796_v0, %v326_v60  ;;  %v330_v0 = vld [vmem:[#allocation2 + $0xc8] sm:$0xff] }
  0xdb   : > { %v911_v6 = vld [vmem:[#allocation2 + $0xa0] sm:$0xff] }
  0xdc   : > { %v829_v7 = vadd.f32 %v759_v3, %v311_v1  ;;  %v947_v8 = vadd.f32 %v1631_v62, %v911_v6  ;;  %877 = vst.msk [vmem:[#allocation2 + $0xa8] sm:$0xff] %vm272_vm3, %v844_v4  ;;  %v315_v3 = vld [vmem:[#allocation2 + $0x50] sm:$0xff] }
  0xdd   : > { %v896_v9 = vld [vmem:[#allocation2 + $0x28] sm:$0xff]  ;;  %v808_v60 = vpop.f32.mrf.mxu3 }
  0xde   : > { %v932_v10 = vadd.f32 %v1631_v62, %v896_v9  ;;  %862 = vst.msk [vmem:[#allocation2 + $0x30] sm:$0xff] %vm272_vm3, %v829_v7  ;;  %v979_v12 = vpack.c.bf16 %v947_v8, %v947_v8 }
  0xdf   : > { %v765_v11 = vpop.f32.mrf.mxu1  ;;  %v709_v15 = vpop.f32.mrf.mxu2 }
  0xe0   : > { %v964_v13 = vpack.c.bf16 %v932_v10, %v932_v10  ;;  %1012 = vst.msk [vmem:[%s1639_s23 + $0x50] sm:$0xf] %vm991_vm4, %v979_v12  ;;  %v799_v16 = vadd.f32 %v798_v41, %v709_v15 }
  0xe1   : > { %v671_v18 = vpop.f32.mrf.mxu0 }
  0xe2   : > { %997 = vst.msk [vmem:[%s1639_s23 + $0x14] sm:$0xf] %vm991_vm4, %v964_v13  ;;  %v761_v19 = vadd.f32 %v760_v40, %v671_v18  ;;  %v845_v21 = vadd.f32 %v799_v16, %v327_v14  ;;  %v331_v16 = vld [vmem:[#allocation2 + $0xd0] sm:$0xff] }
  0xe3   : > { %v912_v22 = vld [vmem:[#allocation2 + $0xa8] sm:$0xff] }
  0xe4   : > { %v830_v23 = vadd.f32 %v761_v19, %v312_v17  ;;  %v948_v24 = vadd.f32 %v1631_v62, %v912_v22  ;;  %878 = vst.msk [vmem:[#allocation2 + $0xb0] sm:$0xff] %vm272_vm3, %v845_v21 }
  0xe5   : > { %v897_v25 = vld [vmem:[#allocation2 + $0x30] sm:$0xff]  ;;  %v810_v18 = vpop.f32.mrf.mxu3 }
  0xe6   : > { %v933_v26 = vadd.f32 %v1631_v62, %v897_v25  ;;  %863 = vst.msk [vmem:[#allocation2 + $0x38] sm:$0xff] %vm272_vm3, %v830_v23  ;;  %v980_v28 = vpack.c.bf16 %v948_v24, %v948_v24 }
  0xe7   : > { %v768_v27 = vpop.f32.mrf.mxu1  ;;  %v711_v31 = vpop.f32.mrf.mxu2 }
  0xe8   : > { %v965_v29 = vpack.c.bf16 %v933_v26, %v933_v26  ;;  %1013 = vst.msk [vmem:[%s1639_s23 + $0x54] sm:$0xf] %vm991_vm4, %v980_v28  ;;  %v801_v32 = vadd.f32 %v800_v63, %v711_v31 }
  0xe9   : > { %v674_v34 = vpop.f32.mrf.mxu0 }
  0xea   : > { %998 = vst.msk [vmem:[%s1639_s23 + $0x18] sm:$0xf] %vm991_vm4, %v965_v29  ;;  %v764_v35 = vadd.f32 %v763_v56, %v674_v34  ;;  %v846_v36 = vadd.f32 %v801_v32, %v328_v30  ;;  %v332_v32 = vld [vmem:[#allocation2 + $0xd8] sm:$0xff] }
  0xeb   : > { %v913_v37 = vld [vmem:[#allocation2 + $0xb0] sm:$0xff] }
  0xec   : > { %v831_v38 = vadd.f32 %v764_v35, %v313_v33  ;;  %v949_v40 = vadd.f32 %v1631_v62, %v913_v37  ;;  %879 = vst.msk [vmem:[#allocation2 + $0xb8] sm:$0xff] %vm272_vm3, %v846_v36  ;;  %v317_v35 = vld [vmem:[#allocation2 + $0x60] sm:$0xff] }
  0xed   : > { %v898_v41 = vld [vmem:[#allocation2 + $0x38] sm:$0xff]  ;;  %v813_v37 = vpop.f32.mrf.mxu3 }
  0xee   : > { %v934_v42 = vadd.f32 %v1631_v62, %v898_v41  ;;  %864 = vst.msk [vmem:[#allocation2 + $0x40] sm:$0xff] %vm272_vm3, %v831_v38  ;;  %v981_v44 = vpack.c.bf16 %v949_v40, %v949_v40 }
  0xef   : > { %v770_v43 = vpop.f32.mrf.mxu1  ;;  %v714_v47 = vpop.f32.mrf.mxu2 }
  0xf0   : > { %v966_v45 = vpack.c.bf16 %v934_v42, %v934_v42  ;;  %1014 = vst.msk [vmem:[%s1639_s23 + $0x58] sm:$0xf] %vm991_vm4, %v981_v44  ;;  %v804_v48 = vadd.f32 %v803_v20, %v714_v47  ;;  %v316_v20 = vld [vmem:[#allocation2 + $0x58] sm:$0xff] }
  0xf1   : > { %v676_v50 = vpop.f32.mrf.mxu0 }
  0xf2   : > { %999 = vst.msk [vmem:[%s1639_s23 + $0x1c] sm:$0xf] %vm991_vm4, %v966_v45  ;;  %v766_v51 = vadd.f32 %v765_v11, %v676_v50  ;;  %v847_v52 = vadd.f32 %v804_v48, %v329_v46  ;;  %v333_v48 = vld [vmem:[#allocation2 + $0xe0] sm:$0xff] }
  0xf3   : > { %v914_v53 = vld [vmem:[#allocation2 + $0xb8] sm:$0xff] }
  0xf4   : > { %v832_v54 = vadd.f32 %v766_v51, %v314_v49  ;;  %v950_v55 = vadd.f32 %v1631_v62, %v914_v53  ;;  %880 = vst.msk [vmem:[#allocation2 + $0xc0] sm:$0xff] %vm272_vm3, %v847_v52  ;;  %v318_v51 = vld [vmem:[#allocation2 + $0x68] sm:$0xff] }
  0xf5   : > { %v899_v56 = vld [vmem:[#allocation2 + $0x40] sm:$0xff] }
  0xf6   : > { %v935_v57 = vadd.f32 %v1631_v62, %v899_v56  ;;  %865 = vst.msk [vmem:[#allocation2 + $0x48] sm:$0xff] %vm272_vm3, %v832_v54  ;;  %v982_v61 = vpack.c.bf16 %v950_v55, %v950_v55  ;;  %v815_v56 = vpop.f32.mrf.mxu3 }
  0xf7   : > { %v773_v59 = vpop.f32.mrf.mxu1  ;;  %v716_v1 = vpop.f32.mrf.mxu2 }
  0xf8   : > { %v967_v63 = vpack.c.bf16 %v935_v57, %v935_v57  ;;  %1015 = vst.msk [vmem:[%s1639_s23 + $0x5c] sm:$0xf] %vm991_vm4, %v982_v61  ;;  %v806_v2 = vadd.f32 %v805_v39, %v716_v1 }
  0xf9   : > { %v679_v4 = vpop.f32.mrf.mxu0 }
  0xfa   : > { %1000 = vst.msk [vmem:[%s1639_s23 + $0x20] sm:$0xf] %vm991_vm4, %v967_v63  ;;  %v769_v6 = vadd.f32 %v768_v27, %v679_v4  ;;  %v848_v7 = vadd.f32 %v806_v2, %v330_v0  ;;  %v321_v63 = vld [vmem:[#allocation2 + $0x80] sm:$0xff]  ;;  %v334_v4 = vld [vmem:[#allocation2 + $0xe8] sm:$0xff] }
  0xfb   : > { %v915_v8 = vld [vmem:[#allocation2 + $0xc0] sm:$0xff] }
  0xfc   : > { %v833_v9 = vadd.f32 %v769_v6, %v315_v3  ;;  %v951_v10 = vadd.f32 %v1631_v62, %v915_v8  ;;  %881 = vst.msk [vmem:[#allocation2 + $0xc8] sm:$0xff] %vm272_vm3, %v848_v7 }
  0xfd   : > { %v900_v11 = vld [vmem:[#allocation2 + $0x48] sm:$0xff] }
  0xfe   : > { %v936_v12 = vadd.f32 %v1631_v62, %v900_v11  ;;  %866 = vst.msk [vmem:[#allocation2 + $0x50] sm:$0xff] %vm272_vm3, %v833_v9  ;;  %v983_v14 = vpack.c.bf16 %v951_v10, %v951_v10  ;;  %v319_v9 = vld [vmem:[#allocation2 + $0x70] sm:$0xff] }
  0xff   : > { %v775_v13 = vpop.f32.mrf.mxu1  ;;  %v719_v17 = vpop.f32.mrf.mxu2 }
 0x100   : > { %v968_v15 = vpack.c.bf16 %v936_v12, %v936_v12  ;;  %1016 = vst.msk [vmem:[%s1639_s23 + $0x60] sm:$0xf] %vm991_vm4, %v983_v14  ;;  %v809_v19 = vadd.f32 %v808_v60, %v719_v17  ;;  %v818_v17 = vpop.f32.mrf.mxu3 }
 0x101   : > { %v681_v21 = vpop.f32.mrf.mxu0 }
 0x102   : > { %1001 = vst.msk [vmem:[%s1639_s23 + $0x24] sm:$0xf] %vm991_vm4, %v968_v15  ;;  %v771_v22 = vadd.f32 %v770_v43, %v681_v21  ;;  %v849_v23 = vadd.f32 %v809_v19, %v331_v16 }
 0x103   : > { %v916_v24 = vld [vmem:[#allocation2 + $0xc8] sm:$0xff] }
 0x104   : > { %v834_v25 = vadd.f32 %v771_v22, %v316_v20  ;;  %v952_v26 = vadd.f32 %v1631_v62, %v916_v24  ;;  %882 = vst.msk [vmem:[#allocation2 + $0xd0] sm:$0xff] %vm272_vm3, %v849_v23  ;;  %v335_v23 = vld [vmem:[#allocation2 + $0xf0] sm:$0xff] }
 0x105   : > { %v901_v27 = vld [vmem:[#allocation2 + $0x50] sm:$0xff] }
 0x106   : > { %v937_v28 = vadd.f32 %v1631_v62, %v901_v27  ;;  %867 = vst.msk [vmem:[#allocation2 + $0x58] sm:$0xff] %vm272_vm3, %v834_v25  ;;  %v984_v30 = vpack.c.bf16 %v952_v26, %v952_v26  ;;  %v320_v27 = vld [vmem:[#allocation2 + $0x78] sm:$0xff] }
 0x107   : > { %v778_v29 = vpop.f32.mrf.mxu1  ;;  %v721_v33 = vpop.f32.mrf.mxu2 }
 0x108   : > { %v969_v31 = vpack.c.bf16 %v937_v28, %v937_v28  ;;  %1017 = vst.msk [vmem:[%s1639_s23 + $0x64] sm:$0xf] %vm991_vm4, %v984_v30  ;;  %v811_v34 = vadd.f32 %v810_v18, %v721_v33  ;;  %v322_v18 = vld [vmem:[#allocation2 + $0x88] sm:$0xff] }
 0x109   : > { %v684_v36 = vpop.f32.mrf.mxu0 }
 0x10a   : > { %1002 = vst.msk [vmem:[%s1639_s23 + $0x28] sm:$0xf] %vm991_vm4, %v969_v31  ;;  %v774_v38 = vadd.f32 %v773_v59, %v684_v36  ;;  %v850_v39 = vadd.f32 %v811_v34, %v332_v32 }
 0x10b   : > { %v917_v40 = vld [vmem:[#allocation2 + $0xd0] sm:$0xff] }
 0x10c   : > { %v835_v41 = vadd.f32 %v774_v38, %v317_v35  ;;  %v953_v42 = vadd.f32 %v1631_v62, %v917_v40  ;;  %883 = vst.msk [vmem:[#allocation2 + $0xd8] sm:$0xff] %vm272_vm3, %v850_v39  ;;  %v820_v40 = vpop.f32.mrf.mxu3 }
 0x10d   : > { %v902_v43 = vld [vmem:[#allocation2 + $0x58] sm:$0xff] }
 0x10e   : > { %v938_v44 = vadd.f32 %v1631_v62, %v902_v43  ;;  %868 = vst.msk [vmem:[#allocation2 + $0x60] sm:$0xff] %vm272_vm3, %v835_v41  ;;  %v985_v46 = vpack.c.bf16 %v953_v42, %v953_v42  ;;  %v336_v41 = vld [vmem:[#allocation2 + $0xf8] sm:$0xff] }
 0x10f   : > { %v780_v45 = vpop.f32.mrf.mxu1  ;;  %v724_v49 = vpop.f32.mrf.mxu2 }
 0x110   : > { %v970_v47 = vpack.c.bf16 %v938_v44, %v938_v44  ;;  %1018 = vst.msk [vmem:[%s1639_s23 + $0x68] sm:$0xf] %vm991_vm4, %v985_v46  ;;  %v814_v50 = vadd.f32 %v813_v37, %v724_v49 }
 0x111   : > { %v686_v52 = vpop.f32.mrf.mxu0 }
 0x112   : > { %1003 = vst.msk [vmem:[%s1639_s23 + $0x2c] sm:$0xf] %vm991_vm4, %v970_v47  ;;  %v776_v53 = vadd.f32 %v775_v13, %v686_v52  ;;  %v851_v54 = vadd.f32 %v814_v50, %v333_v48 }
 0x113   : > { %v918_v55 = vld [vmem:[#allocation2 + $0xd8] sm:$0xff] }
 0x114   : > { %v836_v57 = vadd.f32 %v776_v53, %v318_v51  ;;  %v954_v59 = vadd.f32 %v1631_v62, %v918_v55  ;;  %884 = vst.msk [vmem:[#allocation2 + $0xe0] sm:$0xff] %vm272_vm3, %v851_v54 }
 0x115   : > { %v903_v60 = vld [vmem:[#allocation2 + $0x60] sm:$0xff] }
 0x116   : > { %v939_v61 = vadd.f32 %v1631_v62, %v903_v60  ;;  %869 = vst.msk [vmem:[#allocation2 + $0x68] sm:$0xff] %vm272_vm3, %v836_v57  ;;  %v986_v1 = vpack.c.bf16 %v954_v59, %v954_v59 }
 0x117   : > { %v783_v0 = vpop.f32.mrf.mxu1  ;;  %v726_v6 = vpop.f32.mrf.mxu2 }
 0x118   : > { %v784_v2 = vadd.f32 %v783_v0, %v1626_v58  ;;  %v971_v3 = vpack.c.bf16 %v939_v61, %v939_v61  ;;  %1019 = vst.msk [vmem:[%s1639_s23 + $0x6c] sm:$0xf] %vm991_vm4, %v986_v1  ;;  %v816_v8 = vadd.f32 %v815_v56, %v726_v6 }
 0x119   : > { %v689_v10 = vpop.f32.mrf.mxu0 }
 0x11a   : > { %v839_v7 = vadd.f32 %v784_v2, %v321_v63  ;;  %1004 = vst.msk [vmem:[%s1639_s23 + $0x30] sm:$0xf] %vm991_vm4, %v971_v3  ;;  %v779_v11 = vadd.f32 %v778_v29, %v689_v10  ;;  %v852_v12 = vadd.f32 %v816_v8, %v334_v4 }
 0x11b   : > { %v919_v13 = vld [vmem:[#allocation2 + $0xe0] sm:$0xff] }
 0x11c   : > { %872 = vst.msk [vmem:[#allocation2 + $0x80] sm:$0xff] %vm272_vm3, %v839_v7  ;;  %v837_v14 = vadd.f32 %v779_v11, %v319_v9  ;;  %v955_v58 = vadd.f32 %v1631_v62, %v919_v13 }
 0x11d   : > { %v904_v15 = vld [vmem:[#allocation2 + $0x68] sm:$0xff]  ;;  %885 = vst.msk [vmem:[#allocation2 + $0xe8] sm:$0xff] %vm272_vm3, %v852_v12 }
 0x11e   : > { %v940_v16 = vadd.f32 %v1631_v62, %v904_v15  ;;  %870 = vst.msk [vmem:[#allocation2 + $0x70] sm:$0xff] %vm272_vm3, %v837_v14  ;;  %v987_v20 = vpack.c.bf16 %v955_v58, %v955_v58 }
 0x11f   : > { %v785_v19 = vpop.f32.mrf.mxu1  ;;  %v729_v24 = vpop.f32.mrf.mxu2 }
 0x120   : > { %v786_v21 = vadd.f32 %v785_v19, %v1641_v5  ;;  %v972_v22 = vpack.c.bf16 %v940_v16, %v940_v16  ;;  %1020 = vst.msk [vmem:[%s1639_s23 + $0x70] sm:$0xf] %vm991_vm4, %v987_v20  ;;  %v819_v26 = vadd.f32 %v818_v17, %v729_v24 }
 0x121   : > { %v691_v28 = vpop.f32.mrf.mxu0 }
 0x122   : > { %v840_v25 = vadd.f32 %v786_v21, %v322_v18  ;;  %1005 = vst.msk [vmem:[%s1639_s23 + $0x34] sm:$0xf] %vm991_vm4, %v972_v22  ;;  %v781_v30 = vadd.f32 %v780_v45, %v691_v28  ;;  %v853_v5 = vadd.f32 %v819_v26, %v335_v23 }
 0x123   : > { %v907_v29 = vld [vmem:[#allocation2 + $0x80] sm:$0xff] }
 0x124   : > { %v943_v31 = vadd.f32 %v1631_v62, %v907_v29  ;;  %873 = vst.msk [vmem:[#allocation2 + $0x88] sm:$0xff] %vm272_vm3, %v840_v25  ;;  %v920_v32 = vld [vmem:[#allocation2 + $0xe8] sm:$0xff]  ;;  %v838_v33 = vadd.f32 %v781_v30, %v320_v27 }
 0x125   : > { %v956_v35 = vadd.f32 %v1631_v62, %v920_v32  ;;  %v905_v36 = vld [vmem:[#allocation2 + $0x70] sm:$0xff]  ;;  %886 = vst.msk [vmem:[#allocation2 + $0xf0] sm:$0xff] %vm272_vm3, %v853_v5 }
 0x126   : > { %v975_v34 = vpack.c.bf16 %v943_v31, %v943_v31  ;;  %v941_v37 = vadd.f32 %v1631_v62, %v905_v36  ;;  %871 = vst.msk [vmem:[#allocation2 + $0x78] sm:$0xff] %vm272_vm3, %v838_v33 }
 0x127   : > { %v988_v38 = vpack.c.bf16 %v956_v35, %v956_v35  ;;  %v731_v42 = vpop.f32.mrf.mxu2 }
 0x128   : > { %1008 = vst.msk [vmem:[%s1639_s23 + $0x40] sm:$0xf] %vm991_vm4, %v975_v34  ;;  %v973_v39 = vpack.c.bf16 %v941_v37, %v941_v37  ;;  %v821_v43 = vadd.f32 %v820_v40, %v731_v42 }
 0x129   : > { %1021 = vst.msk [vmem:[%s1639_s23 + $0x74] sm:$0xf] %vm991_vm4, %v988_v38 }
 0x12a   : > { %1006 = vst.msk [vmem:[%s1639_s23 + $0x38] sm:$0xf] %vm991_vm4, %v973_v39  ;;  %v854_v46 = vadd.f32 %v821_v43, %v336_v41 }
 0x12b   : > { %v908_v44 = vld [vmem:[#allocation2 + $0x88] sm:$0xff] }
 0x12c   : > { %v944_v45 = vadd.f32 %v1631_v62, %v908_v44  ;;  %v921_v47 = vld [vmem:[#allocation2 + $0xf0] sm:$0xff]  ;;  %887 = vst.msk [vmem:[#allocation2 + $0xf8] sm:$0xff] %vm272_vm3, %v854_v46 }
 0x12d   : > { %v957_v49 = vadd.f32 %v1631_v62, %v921_v47  ;;  %v906_v50 = vld [vmem:[#allocation2 + $0x78] sm:$0xff] }
 0x12e   : > { %v976_v48 = vpack.c.bf16 %v944_v45, %v944_v45  ;;  %v942_v51 = vadd.f32 %v1631_v62, %v906_v50 }
 0x12f   : > { %v989_v52 = vpack.c.bf16 %v957_v49, %v957_v49 }
 0x130   : > { %1009 = vst.msk [vmem:[%s1639_s23 + $0x44] sm:$0xf] %vm991_vm4, %v976_v48  ;;  %v974_v53 = vpack.c.bf16 %v942_v51, %v942_v51 }
 0x131   : > { %1022 = vst.msk [vmem:[%s1639_s23 + $0x78] sm:$0xf] %vm991_vm4, %v989_v52 }
 0x132   : > { %1007 = vst.msk [vmem:[%s1639_s23 + $0x3c] sm:$0xf] %vm991_vm4, %v974_v53 }
 0x133   : > { %v922_v54 = vld [vmem:[#allocation2 + $0xf8] sm:$0xff] }
 0x134   : > { %v958_v55 = vadd.f32 %v1631_v62, %v922_v54 }
 0x136   : > { %v990_v56 = vpack.c.bf16 %v958_v55, %v958_v55 }
 0x138   : > { %1023 = vst.msk [vmem:[%s1639_s23 + $0x7c] sm:$0xf] %vm991_vm4, %v990_v56 }
 0x139 PF: > { %s13_s14 = sadd.s32 1, %s1433_s14   ;;  %s1783_s12 = smov %s1429_s13 }
 0x13a   : > { %p10_p5 = scmp.ge.s32.totalorder %s13_s14, 10   ;;  %s1784_s13 = smov %s1786_s15 }
 0x13c   :  { %12 = sbr.rel (!%p10_p5) target bundleno = 2 (0x2), region = 76 }

</bundles_post_ra>
